<compile_context>
chip_gen: v7x
topology: tpu7x:2x2x1
jax: 0.10.0
libtpu: 0.0.40
codegen_flags: <defaults>
</compile_context>

<pallas_src>
import jax
import jax.numpy as jnp
from jax.experimental import pallas as pl
from jax.experimental.pallas import tpu as pltpu

HIDDEN = 20            # hidden_sz
IN_SZ = 3              # preproc=False -> LSTMCell(3, hidden_sz)
MAX_TILE_ROWS = 1024   # ~1.5 MiB double-buffered blocks; >=2 grid steps for N > 1024


def _round_up(x, m):
    return ((x + m - 1) // m) * m


def _gates_to_state(gates, c):
    """PyTorch nn.LSTMCell gate order (i, f, g, o)."""
    H = HIDDEN
    i = jax.nn.sigmoid(gates[:, 0 * H:1 * H])
    f = jax.nn.sigmoid(gates[:, 1 * H:2 * H])
    g = jnp.tanh(gates[:, 2 * H:3 * H])
    o = jax.nn.sigmoid(gates[:, 3 * H:4 * H])
    c_new = f * c + i * g
    h_new = o * jnp.tanh(c_new)
    return h_new, c_new


def optimizer_kernel(x_ref, st_ref,
                     wih1_ref, whh1_ref, b1_ref,
                     w2_ref, b2_ref,
                     wout_ref, bout_ref,
                     gms_ref, sto_ref):
    H = HIDDEN

    x = x_ref[...]                         # (TM, 4) fused [g_prev | u_prev | params | eps]
    st = st_ref[...]                       # (TM, 4H) fused [h0 | c0 | h1 | c1]
    h0 = st[:, 0 * H:1 * H]
    c0 = st[:, 1 * H:2 * H]
    h1 = st[:, 2 * H:3 * H]
    c1 = st[:, 3 * H:4 * H]

    # ---- LSTMCell 1 (3 -> H). K=3 input transform on the VPU (no padded MXU matmul).
    wih1 = wih1_ref[...]                   # (3, 4H)
    gates1 = (x[:, 0:1] * wih1[0:1, :]
              + x[:, 1:2] * wih1[1:2, :]
              + x[:, 2:3] * wih1[2:3, :]
              + jnp.dot(h0, whh1_ref[...], preferred_element_type=jnp.float32)
              + b1_ref[...])
    h0n, c0n = _gates_to_state(gates1, c0)

    # i2_drop(p=0, eval) -> identity
    # ---- LSTMCell 2 (H -> H): single fused K=2H matmul against [wih2; whh2].
    hcat = jnp.concatenate([h0n, h1], axis=-1)          # (TM, 2H)
    gates2 = (jnp.dot(hcat, w2_ref[...], preferred_element_type=jnp.float32)
              + b2_ref[...])
    h1n, c1n = _gates_to_state(gates2, c1)

    # ---- Linear(H, 2) * 0.1 as two VPU multiplies + lane reductions (MXU width-2 waste).
    wout = wout_ref[...]                   # (2, H)  PyTorch (out, in) layout
    bout = bout_ref[...]                   # (1, 2)
    mu = (jnp.sum(h1n * wout[0:1, :], axis=-1, keepdims=True) + bout[:, 0:1]) * 0.1
    lv = (jnp.sum(h1n * wout[1:2, :], axis=-1, keepdims=True) + bout[:, 1:2]) * 0.1
    sigma = jax.nn.softplus(lv)
    g_cur = mu + sigma * x[:, 3:4]         # reparameterized sample

    # fused, single full-width stores
    gms_ref[...] = jnp.concatenate([g_cur, mu, sigma], axis=-1)        # (TM, 3)
    sto_ref[...] = jnp.concatenate([h0n, c0n, h1n, c1n], axis=-1)      # (TM, 4H)


@jax.jit
def optimizer_forward(g_prev, u_prev, params, states, eps, weights):
    """Pallas-backed forward.

    states : fused (N, 4H) = [h0 | c0 | h1 | c1]   (aliased in place to the output)
    weights: packed tuple from pack_weights().
    Returns (gms, new_states):
      gms        (N, 3)  = [g_cur | mu | sigma]
      new_states (N, 4H) = [h0' | c0' | h1' | c1']
    """
    N = g_prev.shape[0]
    H = HIDDEN
    f32 = jnp.float32
    wih1, whh1, b1, w2, b2, wout, bout = weights

    # One fused per-row input slab (mirrors the module's torch.cat, plus eps).
    x = jnp.concatenate([g_prev, u_prev, params, eps], axis=1).astype(f32)   # (N, 4)

    # Row tiling: sublane-aligned tile, ragged-tolerant grid (no padding, no slicing).
    tm = min(_round_up(max(N, 1), 8), MAX_TILE_ROWS)
    grid = (pl.cdiv(N, tm),)

    def row_spec(feat):
        return pl.BlockSpec((tm, feat), lambda i: (i, 0))

    def w_spec(a):
        return pl.BlockSpec(a.shape, lambda i: (0, 0))

    in_specs = [row_spec(4), row_spec(4 * H),
                w_spec(wih1), w_spec(whh1), w_spec(b1),
                w_spec(w2), w_spec(b2),
                w_spec(wout), w_spec(bout)]
    out_specs = [row_spec(3), row_spec(4 * H)]
    out_shapes = (jax.ShapeDtypeStruct((N, 3), f32),        # [g_cur | mu | sigma]
                  jax.ShapeDtypeStruct((N, 4 * H), f32))    # [h0' | c0' | h1' | c1']

    weight_bytes = 4 * int(sum(int(w.size) for w in weights))
    per_row_macs = IN_SZ * 4 * H + H * 4 * H + 2 * H * 4 * H + 2 * H
    cost = pl.CostEstimate(
        flops=int(2 * per_row_macs * N),
        transcendentals=int((10 * H + 2) * N),
        bytes_accessed=int(4 * N * (4 + 4 * H + 3 + 4 * H) + weight_bytes),
    )

    gms, st_new = pl.pallas_call(
        optimizer_kernel,
        out_shape=out_shapes,
        grid=grid,
        in_specs=in_specs,
        out_specs=out_specs,
        input_output_aliases={1: 1},   # caller's fused state slab -> fused state output
        compiler_params=pltpu.CompilerParams(
            dimension_semantics=("parallel",)),
        cost_estimate=cost,
    )(x, states, wih1, whh1, b1, w2, b2, wout, bout)

    return gms, st_new


def init_weights(key):
    """Deterministic init mirroring nn.LSTMCell / nn.Linear uniform init (raw layout)."""
    H = HIDDEN
    ks = jax.random.split(key, 10)
    bound = 1.0 / jnp.sqrt(H)
    u = lambda k, shp, b: jax.random.uniform(k, shp, jnp.float32, -b, b)
    # LSTMCell 1 (3 -> H); weights stored transposed (in, 4H); biases pre-summed.
    wih1 = u(ks[0], (IN_SZ, 4 * H), bound)
    whh1 = u(ks[1], (H, 4 * H), bound)
    b1 = u(ks[2], (1, 4 * H), bound) + u(ks[3], (1, 4 * H), bound)
    # LSTMCell 2 (H -> H)
    wih2 = u(ks[4], (H, 4 * H), bound)
    whh2 = u(ks[5], (H, 4 * H), bound)
    b2 = u(ks[6], (1, 4 * H), bound) + u(ks[7], (1, 4 * H), bound)
    # Linear (H -> 2); PyTorch (out, in) layout.
    wout = u(ks[8], (2, H), bound)
    bout = u(ks[9], (1, 2), bound)
    return (wih1, whh1, b1, wih2, whh2, b2, wout, bout)


def pack_weights(raw):
    """Pack raw weights for the kernel: fuse LSTMCell 2's input/recurrent weights."""
    wih1, whh1, b1, wih2, whh2, b2, wout, bout = raw
    w2 = jnp.concatenate([wih2, whh2], axis=0)     # (2H, 4H), multiplies [h0' | h1]
    return (wih1, whh1, b1, w2, b2, wout, bout)


def reference_forward(g_prev, u_prev, params, states, eps, raw_weights):
    """Pure-JAX reference of the same math (for the correctness check)."""
    wih1, whh1, b1, wih2, whh2, b2, wout, bout = raw_weights
    H = HIDDEN
    h0 = states[:, 0 * H:1 * H]
    c0 = states[:, 1 * H:2 * H]
    h1 = states[:, 2 * H:3 * H]
    c1 = states[:, 3 * H:4 * H]

    def cell(x, h, c, wih, whh, b):
        gates = x @ wih + h @ whh + b
        i = jax.nn.sigmoid(gates[:, 0 * H:1 * H])
        f = jax.nn.sigmoid(gates[:, 1 * H:2 * H])
        g = jnp.tanh(gates[:, 2 * H:3 * H])
        o = jax.nn.sigmoid(gates[:, 3 * H:4 * H])
        c_new = f * c + i * g
        return o * jnp.tanh(c_new), c_new

    x = jnp.concatenate([g_prev, u_prev, params], axis=1)
    h0n, c0n = cell(x, h0, c0, wih1, whh1, b1)
    h1n, c1n = cell(h0n, h1, c1, wih2, whh2, b2)
    mu_lv = (h1n @ wout.T + bout) * 0.1
    mu = mu_lv[:, 0:1]
    sigma = jax.nn.softplus(mu_lv[:, 1:2])
    g_cur = mu + sigma * eps
    return g_cur, mu, sigma, jnp.concatenate([h0n, c0n, h1n, c1n], axis=1)


if __name__ == "__main__":
    H = HIDDEN
    key = jax.random.PRNGKey(0)
    k_w, k_data = jax.random.split(key)
    raw_w = init_weights(k_w)
    weights = pack_weights(raw_w)

    # N=8: exact single tile; N=37: partial (ragged) single tile;
    # N=2500: multi-step grid (3 tiles of 1024) with a partial last tile.
    for N in (8, 37, 2500):
        kk = jax.random.fold_in(k_data, N)
        kg, ku, kp, ks, ke = jax.random.split(kk, 5)
        g_prev = jax.random.normal(kg, (N, 1), jnp.float32)
        u_prev = jax.random.normal(ku, (N, 1), jnp.float32)
        params = jax.random.normal(kp, (N, 1), jnp.float32)
        states = jax.random.normal(ks, (N, 4 * H), jnp.float32) * 0.1
        eps = jax.random.normal(ke, (N, 1), jnp.float32)  # the torch .normal_() sample

        gms, st_new = optimizer_forward(g_prev, u_prev, params, states, eps, weights)
        jax.block_until_ready((gms, st_new))
        g_cur = gms[:, 0:1]
        mu = gms[:, 1:2]
        sigma = gms[:, 2:3]

        g_ref, mu_ref, sg_ref, st_ref = reference_forward(
            g_prev, u_prev, params, states, eps, raw_w)
        assert jnp.allclose(g_cur, g_ref, atol=1e-5), f"g_cur mismatch (N={N})"
        assert jnp.allclose(mu, mu_ref, atol=1e-5), f"mu mismatch (N={N})"
        assert jnp.allclose(sigma, sg_ref, atol=1e-5), f"sigma mismatch (N={N})"
        assert jnp.allclose(st_new, st_ref, atol=1e-5), f"state mismatch (N={N})"

    print("KERNEL_OK")
</pallas_src>

<mosaic_0001>
module attributes {stable_mosaic.version = 11 : i64} {
  func.func @optimizer_kernel(%arg0: i32, %arg1: memref<8x4xf32, #tpu.memory_space<vmem>>, %arg2: memref<8x80xf32, #tpu.memory_space<vmem>>, %arg3: memref<3x80xf32, #tpu.memory_space<vmem>>, %arg4: memref<20x80xf32, #tpu.memory_space<vmem>>, %arg5: memref<1x80xf32, #tpu.memory_space<vmem>>, %arg6: memref<40x80xf32, #tpu.memory_space<vmem>>, %arg7: memref<1x80xf32, #tpu.memory_space<vmem>>, %arg8: memref<2x20xf32, #tpu.memory_space<vmem>>, %arg9: memref<1x2xf32, #tpu.memory_space<vmem>>, %arg10: memref<8x3xf32, #tpu.memory_space<vmem>>, %arg11: memref<8x80xf32, #tpu.memory_space<vmem>>) attributes {dimension_semantics = [#tpu.dimension_semantics<parallel>], iteration_bounds = array<i64: 1>, scalar_prefetch = 0 : i64, scratch_operands = 0 : i64, tpu.core_type = #tpu.core_type<tc>, window_params = [{transform_indices = @transform_0, window_bounds = array<i64: 8, 4>}, {transform_indices = @transform_1, window_bounds = array<i64: 8, 80>}, {pipeline_mode = #tpu.pipeline_mode<synchronous>, transform_indices = @transform_2, window_bounds = array<i64: 3, 80>}, {pipeline_mode = #tpu.pipeline_mode<synchronous>, transform_indices = @transform_3, window_bounds = array<i64: 20, 80>}, {pipeline_mode = #tpu.pipeline_mode<synchronous>, transform_indices = @transform_4, window_bounds = array<i64: 1, 80>}, {pipeline_mode = #tpu.pipeline_mode<synchronous>, transform_indices = @transform_5, window_bounds = array<i64: 40, 80>}, {pipeline_mode = #tpu.pipeline_mode<synchronous>, transform_indices = @transform_6, window_bounds = array<i64: 1, 80>}, {pipeline_mode = #tpu.pipeline_mode<synchronous>, transform_indices = @transform_7, window_bounds = array<i64: 2, 20>}, {pipeline_mode = #tpu.pipeline_mode<synchronous>, transform_indices = @transform_8, window_bounds = array<i64: 1, 2>}, {transform_indices = @transform_9, window_bounds = array<i64: 8, 3>}, {transform_indices = @transform_10, window_bounds = array<i64: 8, 80>}]} {
    %c0 = arith.constant 0 : index
    %c0_0 = arith.constant 0 : index
    %0 = vector.load %arg1[%c0, %c0_0] : memref<8x4xf32, #tpu.memory_space<vmem>>, vector<8x4xf32>
    %c0_1 = arith.constant 0 : index
    %c0_2 = arith.constant 0 : index
    %1 = vector.load %arg2[%c0_1, %c0_2] : memref<8x80xf32, #tpu.memory_space<vmem>>, vector<8x80xf32>
    %2 = vector.extract_strided_slice %1 {offsets = [0, 0], sizes = [8, 20], strides = [1, 1]} : vector<8x80xf32> to vector<8x20xf32>
    %3 = vector.extract_strided_slice %1 {offsets = [0, 20], sizes = [8, 20], strides = [1, 1]} : vector<8x80xf32> to vector<8x20xf32>
    %4 = vector.extract_strided_slice %1 {offsets = [0, 40], sizes = [8, 20], strides = [1, 1]} : vector<8x80xf32> to vector<8x20xf32>
    %5 = vector.extract_strided_slice %1 {offsets = [0, 60], sizes = [8, 20], strides = [1, 1]} : vector<8x80xf32> to vector<8x20xf32>
    %c0_3 = arith.constant 0 : index
    %c0_4 = arith.constant 0 : index
    %6 = vector.load %arg3[%c0_3, %c0_4] : memref<3x80xf32, #tpu.memory_space<vmem>>, vector<3x80xf32>
    %7 = vector.extract_strided_slice %0 {offsets = [0, 0], sizes = [8, 1], strides = [1, 1]} : vector<8x4xf32> to vector<8x1xf32>
    %8 = vector.extract_strided_slice %6 {offsets = [0, 0], sizes = [1, 80], strides = [1, 1]} : vector<3x80xf32> to vector<1x80xf32>
    %9 = vector.broadcast %7 : vector<8x1xf32> to vector<8x80xf32>
    %10 = vector.broadcast %8 : vector<1x80xf32> to vector<8x80xf32>
    %11 = arith.mulf %9, %10 : vector<8x80xf32>
    %12 = vector.extract_strided_slice %0 {offsets = [0, 1], sizes = [8, 1], strides = [1, 1]} : vector<8x4xf32> to vector<8x1xf32>
    %13 = vector.extract_strided_slice %6 {offsets = [1, 0], sizes = [1, 80], strides = [1, 1]} : vector<3x80xf32> to vector<1x80xf32>
    %14 = vector.broadcast %12 : vector<8x1xf32> to vector<8x80xf32>
    %15 = vector.broadcast %13 : vector<1x80xf32> to vector<8x80xf32>
    %16 = arith.mulf %14, %15 : vector<8x80xf32>
    %17 = arith.addf %11, %16 : vector<8x80xf32>
    %18 = vector.extract_strided_slice %0 {offsets = [0, 2], sizes = [8, 1], strides = [1, 1]} : vector<8x4xf32> to vector<8x1xf32>
    %19 = vector.extract_strided_slice %6 {offsets = [2, 0], sizes = [1, 80], strides = [1, 1]} : vector<3x80xf32> to vector<1x80xf32>
    %20 = vector.broadcast %18 : vector<8x1xf32> to vector<8x80xf32>
    %21 = vector.broadcast %19 : vector<1x80xf32> to vector<8x80xf32>
    %22 = arith.mulf %20, %21 : vector<8x80xf32>
    %23 = arith.addf %17, %22 : vector<8x80xf32>
    %c0_5 = arith.constant 0 : index
    %c0_6 = arith.constant 0 : index
    %24 = vector.load %arg4[%c0_5, %c0_6] : memref<20x80xf32, #tpu.memory_space<vmem>>, vector<20x80xf32>
    %cst = arith.constant dense<0.000000e+00> : vector<8x80xf32>
    %25 = tpu.matmul %2, %24, %cst {dimension_numbers = #tpu.dot_dimension_numbers<[1], [0], [0], [1], [0, 0, 1, 1], [], []>} : vector<8x20xf32>, vector<20x80xf32>, vector<8x80xf32> -> vector<8x80xf32>
    %26 = arith.addf %23, %25 : vector<8x80xf32>
    %c0_7 = arith.constant 0 : index
    %c0_8 = arith.constant 0 : index
    %27 = vector.load %arg5[%c0_7, %c0_8] : memref<1x80xf32, #tpu.memory_space<vmem>>, vector<1x80xf32>
    %28 = vector.broadcast %27 : vector<1x80xf32> to vector<8x80xf32>
    %29 = arith.addf %26, %28 : vector<8x80xf32>
    %30 = vector.extract_strided_slice %29 {offsets = [0, 0], sizes = [8, 20], strides = [1, 1]} : vector<8x80xf32> to vector<8x20xf32>
    %31 = arith.negf %30 : vector<8x20xf32>
    %32 = math.exp %31 : vector<8x20xf32>
    %cst_9 = arith.constant 1.000000e+00 : f32
    %33 = vector.broadcast %cst_9 : f32 to vector<8x20xf32>
    %34 = arith.addf %33, %32 : vector<8x20xf32>
    %35 = arith.divf %33, %34 : vector<8x20xf32>
    %36 = vector.extract_strided_slice %29 {offsets = [0, 20], sizes = [8, 20], strides = [1, 1]} : vector<8x80xf32> to vector<8x20xf32>
    %37 = arith.negf %36 : vector<8x20xf32>
    %38 = math.exp %37 : vector<8x20xf32>
    %cst_10 = arith.constant 1.000000e+00 : f32
    %39 = vector.broadcast %cst_10 : f32 to vector<8x20xf32>
    %40 = arith.addf %39, %38 : vector<8x20xf32>
    %41 = arith.divf %39, %40 : vector<8x20xf32>
    %42 = vector.extract_strided_slice %29 {offsets = [0, 40], sizes = [8, 20], strides = [1, 1]} : vector<8x80xf32> to vector<8x20xf32>
    %43 = math.tanh %42 : vector<8x20xf32>
    %44 = vector.extract_strided_slice %29 {offsets = [0, 60], sizes = [8, 20], strides = [1, 1]} : vector<8x80xf32> to vector<8x20xf32>
    %45 = arith.negf %44 : vector<8x20xf32>
    %46 = math.exp %45 : vector<8x20xf32>
    %cst_11 = arith.constant 1.000000e+00 : f32
    %47 = vector.broadcast %cst_11 : f32 to vector<8x20xf32>
    %48 = arith.addf %47, %46 : vector<8x20xf32>
    %49 = arith.divf %47, %48 : vector<8x20xf32>
    %50 = arith.mulf %41, %3 : vector<8x20xf32>
    %51 = arith.mulf %35, %43 : vector<8x20xf32>
    %52 = arith.addf %50, %51 : vector<8x20xf32>
    %53 = math.tanh %52 : vector<8x20xf32>
    %54 = arith.mulf %49, %53 : vector<8x20xf32>
    %55 = tpu.concatenate %54, %4 in 1 : vector<8x20xf32>, vector<8x20xf32> -> vector<8x40xf32>
    %c0_12 = arith.constant 0 : index
    %c0_13 = arith.constant 0 : index
    %56 = vector.load %arg6[%c0_12, %c0_13] : memref<40x80xf32, #tpu.memory_space<vmem>>, vector<40x80xf32>
    %cst_14 = arith.constant dense<0.000000e+00> : vector<8x80xf32>
    %57 = tpu.matmul %55, %56, %cst_14 {dimension_numbers = #tpu.dot_dimension_numbers<[1], [0], [0], [1], [0, 0, 1, 1], [], []>} : vector<8x40xf32>, vector<40x80xf32>, vector<8x80xf32> -> vector<8x80xf32>
    %c0_15 = arith.constant 0 : index
    %c0_16 = arith.constant 0 : index
    %58 = vector.load %arg7[%c0_15, %c0_16] : memref<1x80xf32, #tpu.memory_space<vmem>>, vector<1x80xf32>
    %59 = vector.broadcast %58 : vector<1x80xf32> to vector<8x80xf32>
    %60 = arith.addf %57, %59 : vector<8x80xf32>
    %61 = vector.extract_strided_slice %60 {offsets = [0, 0], sizes = [8, 20], strides = [1, 1]} : vector<8x80xf32> to vector<8x20xf32>
    %62 = arith.negf %61 : vector<8x20xf32>
    %63 = math.exp %62 : vector<8x20xf32>
    %cst_17 = arith.constant 1.000000e+00 : f32
    %64 = vector.broadcast %cst_17 : f32 to vector<8x20xf32>
    %65 = arith.addf %64, %63 : vector<8x20xf32>
    %66 = arith.divf %64, %65 : vector<8x20xf32>
    %67 = vector.extract_strided_slice %60 {offsets = [0, 20], sizes = [8, 20], strides = [1, 1]} : vector<8x80xf32> to vector<8x20xf32>
    %68 = arith.negf %67 : vector<8x20xf32>
    %69 = math.exp %68 : vector<8x20xf32>
    %cst_18 = arith.constant 1.000000e+00 : f32
    %70 = vector.broadcast %cst_18 : f32 to vector<8x20xf32>
    %71 = arith.addf %70, %69 : vector<8x20xf32>
    %72 = arith.divf %70, %71 : vector<8x20xf32>
    %73 = vector.extract_strided_slice %60 {offsets = [0, 40], sizes = [8, 20], strides = [1, 1]} : vector<8x80xf32> to vector<8x20xf32>
    %74 = math.tanh %73 : vector<8x20xf32>
    %75 = vector.extract_strided_slice %60 {offsets = [0, 60], sizes = [8, 20], strides = [1, 1]} : vector<8x80xf32> to vector<8x20xf32>
    %76 = arith.negf %75 : vector<8x20xf32>
    %77 = math.exp %76 : vector<8x20xf32>
    %cst_19 = arith.constant 1.000000e+00 : f32
    %78 = vector.broadcast %cst_19 : f32 to vector<8x20xf32>
    %79 = arith.addf %78, %77 : vector<8x20xf32>
    %80 = arith.divf %78, %79 : vector<8x20xf32>
    %81 = arith.mulf %72, %5 : vector<8x20xf32>
    %82 = arith.mulf %66, %74 : vector<8x20xf32>
    %83 = arith.addf %81, %82 : vector<8x20xf32>
    %84 = math.tanh %83 : vector<8x20xf32>
    %85 = arith.mulf %80, %84 : vector<8x20xf32>
    %c0_20 = arith.constant 0 : index
    %c0_21 = arith.constant 0 : index
    %86 = vector.load %arg8[%c0_20, %c0_21] : memref<2x20xf32, #tpu.memory_space<vmem>>, vector<2x20xf32>
    %c0_22 = arith.constant 0 : index
    %c0_23 = arith.constant 0 : index
    %87 = vector.load %arg9[%c0_22, %c0_23] : memref<1x2xf32, #tpu.memory_space<vmem>>, vector<1x2xf32>
    %88 = vector.extract_strided_slice %86 {offsets = [0, 0], sizes = [1, 20], strides = [1, 1]} : vector<2x20xf32> to vector<1x20xf32>
    %89 = vector.broadcast %88 : vector<1x20xf32> to vector<8x20xf32>
    %90 = arith.mulf %85, %89 : vector<8x20xf32>
    %cst_24 = arith.constant dense<0.000000e+00> : vector<8xf32>
    %91 = vector.multi_reduction <add>, %90, %cst_24 [1] : vector<8x20xf32> to vector<8xf32>
    %92 = vector.shape_cast %91 : vector<8xf32> to vector<8x1xf32>
    %93 = vector.extract_strided_slice %87 {offsets = [0, 0], sizes = [1, 1], strides = [1, 1]} : vector<1x2xf32> to vector<1x1xf32>
    %94 = vector.broadcast %93 : vector<1x1xf32> to vector<8x1xf32>
    %95 = arith.addf %92, %94 : vector<8x1xf32>
    %cst_25 = arith.constant 1.000000e-01 : f32
    %96 = vector.broadcast %cst_25 : f32 to vector<8x1xf32>
    %97 = arith.mulf %95, %96 : vector<8x1xf32>
    %98 = vector.extract_strided_slice %86 {offsets = [1, 0], sizes = [1, 20], strides = [1, 1]} : vector<2x20xf32> to vector<1x20xf32>
    %99 = vector.broadcast %98 : vector<1x20xf32> to vector<8x20xf32>
    %100 = arith.mulf %85, %99 : vector<8x20xf32>
    %cst_26 = arith.constant dense<0.000000e+00> : vector<8xf32>
    %101 = vector.multi_reduction <add>, %100, %cst_26 [1] : vector<8x20xf32> to vector<8xf32>
    %102 = vector.shape_cast %101 : vector<8xf32> to vector<8x1xf32>
    %103 = vector.extract_strided_slice %87 {offsets = [0, 1], sizes = [1, 1], strides = [1, 1]} : vector<1x2xf32> to vector<1x1xf32>
    %104 = vector.broadcast %103 : vector<1x1xf32> to vector<8x1xf32>
    %105 = arith.addf %102, %104 : vector<8x1xf32>
    %cst_27 = arith.constant 1.000000e-01 : f32
    %106 = vector.broadcast %cst_27 : f32 to vector<8x1xf32>
    %107 = arith.mulf %105, %106 : vector<8x1xf32>
    %cst_28 = arith.constant 0.000000e+00 : f32
    %108 = vector.broadcast %cst_28 : f32 to vector<8x1xf32>
    %109 = arith.maximumf %107, %108 : vector<8x1xf32>
    %110 = vector.broadcast %cst_28 : f32 to vector<8x1xf32>
    %111 = arith.subf %107, %110 : vector<8x1xf32>
    %112 = arith.cmpf one, %111, %111 : vector<8x1xf32>
    %113 = vector.broadcast %cst_28 : f32 to vector<8x1xf32>
    %114 = arith.addf %107, %113 : vector<8x1xf32>
    %115 = math.absf %111 : vector<8x1xf32>
    %cst_29 = arith.constant 0.000000e+00 : f32
    %116 = vector.broadcast %cst_29 : f32 to vector<8x1xf32>
    %117 = arith.subf %116, %115 : vector<8x1xf32>
    %118 = math.exp %117 : vector<8x1xf32>
    %119 = math.log1p %118 : vector<8x1xf32>
    %120 = arith.addf %109, %119 : vector<8x1xf32>
    %121 = arith.select %112, %114, %120 : vector<8x1xi1>, vector<8x1xf32>
    %122 = vector.extract_strided_slice %0 {offsets = [0, 3], sizes = [8, 1], strides = [1, 1]} : vector<8x4xf32> to vector<8x1xf32>
    %123 = arith.mulf %121, %122 : vector<8x1xf32>
    %124 = arith.addf %97, %123 : vector<8x1xf32>
    %125 = tpu.concatenate %124, %97, %121 in 1 : vector<8x1xf32>, vector<8x1xf32>, vector<8x1xf32> -> vector<8x3xf32>
    %c0_30 = arith.constant 0 : index
    %c0_31 = arith.constant 0 : index
    %126 = vector.load %arg10[%c0_30, %c0_31] : memref<8x3xf32, #tpu.memory_space<vmem>>, vector<8x3xf32>
    tpu.vector_store %arg10[%c0_30, %c0_31], %125 {strides = array<i32>} : memref<8x3xf32, #tpu.memory_space<vmem>>, vector<8x3xf32>,
    %127 = tpu.concatenate %54, %52, %85, %83 in 1 : vector<8x20xf32>, vector<8x20xf32>, vector<8x20xf32>, vector<8x20xf32> -> vector<8x80xf32>
    %c0_32 = arith.constant 0 : index
    %c0_33 = arith.constant 0 : index
    %128 = vector.load %arg11[%c0_32, %c0_33] : memref<8x80xf32, #tpu.memory_space<vmem>>, vector<8x80xf32>
    tpu.vector_store %arg11[%c0_32, %c0_33], %127 {strides = array<i32>} : memref<8x80xf32, #tpu.memory_space<vmem>>, vector<8x80xf32>,
    return
  }
  func.func @transform_0(%arg0: i32) -> (i32, i32) {
    %c0_i32 = arith.constant 0 : i32
    %c0_i32_0 = arith.constant 0 : i32
    return %arg0, %c0_i32 : i32, i32
  }
  func.func @transform_1(%arg0: i32) -> (i32, i32) {
    %c0_i32 = arith.constant 0 : i32
    %c0_i32_0 = arith.constant 0 : i32
    return %arg0, %c0_i32 : i32, i32
  }
  func.func @transform_2(%arg0: i32) -> (i32, i32) {
    %c0_i32 = arith.constant 0 : i32
    %c0_i32_0 = arith.constant 0 : i32
    %c0_i32_1 = arith.constant 0 : i32
    return %c0_i32, %c0_i32_0 : i32, i32
  }
  func.func @transform_3(%arg0: i32) -> (i32, i32) {
    %c0_i32 = arith.constant 0 : i32
    %c0_i32_0 = arith.constant 0 : i32
    %c0_i32_1 = arith.constant 0 : i32
    return %c0_i32, %c0_i32_0 : i32, i32
  }
  func.func @transform_4(%arg0: i32) -> (i32, i32) {
    %c0_i32 = arith.constant 0 : i32
    %c0_i32_0 = arith.constant 0 : i32
    %c0_i32_1 = arith.constant 0 : i32
    return %c0_i32, %c0_i32_0 : i32, i32
  }
  func.func @transform_5(%arg0: i32) -> (i32, i32) {
    %c0_i32 = arith.constant 0 : i32
    %c0_i32_0 = arith.constant 0 : i32
    %c0_i32_1 = arith.constant 0 : i32
    return %c0_i32, %c0_i32_0 : i32, i32
  }
  func.func @transform_6(%arg0: i32) -> (i32, i32) {
    %c0_i32 = arith.constant 0 : i32
    %c0_i32_0 = arith.constant 0 : i32
    %c0_i32_1 = arith.constant 0 : i32
    return %c0_i32, %c0_i32_0 : i32, i32
  }
  func.func @transform_7(%arg0: i32) -> (i32, i32) {
    %c0_i32 = arith.constant 0 : i32
    %c0_i32_0 = arith.constant 0 : i32
    %c0_i32_1 = arith.constant 0 : i32
    return %c0_i32, %c0_i32_0 : i32, i32
  }
  func.func @transform_8(%arg0: i32) -> (i32, i32) {
    %c0_i32 = arith.constant 0 : i32
    %c0_i32_0 = arith.constant 0 : i32
    %c0_i32_1 = arith.constant 0 : i32
    return %c0_i32, %c0_i32_0 : i32, i32
  }
  func.func @transform_9(%arg0: i32) -> (i32, i32) {
    %c0_i32 = arith.constant 0 : i32
    %c0_i32_0 = arith.constant 0 : i32
    return %arg0, %c0_i32 : i32, i32
  }
  func.func @transform_10(%arg0: i32) -> (i32, i32) {
    %c0_i32 = arith.constant 0 : i32
    %c0_i32_0 = arith.constant 0 : i32
    return %arg0, %c0_i32 : i32, i32
  }
}

</mosaic_0001>

<bundles_post_ra>
// kernel: optimizer_forward.1
= control target key start
LH: loop header
LB: loop body
LE: loop exit
PB: predicated region body
PF: predicated region fallthrough
CT: control target
= control target key end

     0   :  { %v497_v0 = vmov 0.0|0.0   ;;  %vm498_vm0 = vmmov 0   ;;  %v499_v3 = vmov 0.0   ;;  %v500_v5 = vmov 0   ;;  %s504_s24 = smov 20   ;;  %s505_s12 = smov 40   ;;  %s682_s3 = inlined_call_operand.vmem [shape: f32[20,80], index: 3, kind: input, shape index: {}]   ;;  %s683_s0 = inlined_call_operand.vmem [shape: f32[8,4], index: 0, kind: input, shape index: {}]   ;;  %s684_s1 = inlined_call_operand.vmem [shape: f32[8,80], index: 1, kind: input, shape index: {}, may-alias: {1,10}]   ;;  %s685_s2 = inlined_call_operand.vmem [shape: f32[3,80], index: 2, kind: input, shape index: {}]   ;;  %s686_s4 = inlined_call_operand.vmem [shape: f32[1,80], index: 4, kind: input, shape index: {}]   ;;  %s687_s5 = inlined_call_operand.vmem [shape: f32[40,80], index: 5, kind: input, shape index: {}]   ;;  %s688_s6 = inlined_call_operand.vmem [shape: f32[1,80], index: 6, kind: input, shape index: {}]   ;;  %s689_s7 = inlined_call_operand.vmem [shape: f32[2,20], index: 7, kind: input, shape index: {}]   ;;  %s690_s8 = inlined_call_operand.vmem [shape: f32[1,2], index: 8, kind: input, shape index: {}]   ;;  %s691_s10 = inlined_call_operand.vmem [shape: f32[8,80], index: 10, kind: output, shape index: {1}, may-alias: {1,10}]   ;;  %s692_s9 = inlined_call_operand.vmem [shape: f32[8,3], index: 9, kind: output, shape index: {0}]  }
   0x1   :  { %449 = vmatprep.subr.bf16.mxu0 %v497_v0  ;;  %v67_v1 = vld [vmem:[%s682_s3] sm:$0xff]  ;;  %v68_v2 = vld [vmem:[%s682_s3 + $0x8] sm:$0xff]  ;;  %433 = vmatprep.mubr.msk.f32.mxu0 %vm498_vm0, %v499_v3  ;;  %v501_v7 = vmov 2   ;;  %v69_v8 = vld [vmem:[%s682_s3 + $0x10] sm:$0xf]  ;;  %vm74_vm1 = vcmask 1043456   ;;  %v42_v11 = vlaneseq }
   0x2   :  { %v450_v4 = vpack.c.bf16 %v68_v2, %v67_v1  ;;  %473 = vset.pattern.permute.xlu0 %v500_v5  ;;  %v579_v6 = vld [vmem:[%s683_s0] sm:$0xff]  ;;  %452 = vmatprep.subr.bf16.mxu1 %v497_v0  ;;  %vm70_vm2 = vcmask 162816   ;;  %v502_v10 = vmov 1   ;;  %v190_v44 = vld [vmem:[%s687_s5 + $0x8] sm:$0xff]  ;;  %v191_v45 = vld [vmem:[%s687_s5 + $0x10] sm:$0xff]  ;;  %s506_s13 = smov 108  }
   0x3   :  { %39 = vperm.xlu0 %473, %v579_v6   ;;  %475 = vset.pattern.permute.xlu1 %v501_v7  ;;  %v593_v9 = vld [vmem:[%s684_s1] sm:$0xff]  ;;  %v598_v12 = vshrl.u32 %v42_v11, 7  ;;  %v192_v47 = vld [vmem:[%s687_s5 + $0x18] sm:$0xff]  ;;  %s507_s16 = smov 68   ;;  %vm201_vm3 = vcmask 326656   ;;  %s510_s21 = smov 1  }
   0x4   :  { %451 = vmatpush3.bf16.msra.mxu0 %v450_v4  ;;  %58 = vperm.xlu1 %475, %v579_v6   ;;  %v36_v16 = vld [vmem:[%s685_s2] sm:$0x7]  ;;  %s503_s2 = smov 88   ;;  %v456_v48 = vpack.c.bf16 %v192_v47, %v191_v45  ;;  %vm397_vm4 = vcmask 490496   ;;  %vm399_vm5 = vcmask 654336   ;;  %s511_s3 = smov 127  }
   0x5   :  { %431 = vmatprep.subr.mxu0 %v499_v3  ;;  %446 = vmatprep.mubr.msk.f32.mxu1 %vm498_vm0, %v499_v3  ;;  %v44_v14 = vsub.s32 0, %v598_v12  ;;  %v53_v15 = vsub.s32 1, %v598_v12  ;;  %v63_v19 = vsub.s32 2, %v598_v12  ;;  %v411_v29 = vld [vmem:[%s686_s4] ss:$0 sm:$0xff]  ;;  %vm381_vm8 = vcmask 7168  }
   0x6   :  { %v189_v43 = vld [vmem:[%s687_s5] sm:$0xff]  ;;  %vm383_vm9 = vcmask 15360   ;;  %vm385_vm10 = vcmask 23552  }
   0x7   :  { %474 = vset.pattern.permute.xlu0 %v502_v10  ;;  %v45_v17 = vrot.slane %v36_v16, %v44_v14  ;;  %v54_v18 = vrot.slane %v36_v16, %v53_v15  ;;  %v64_v23 = vrot.slane %v36_v16, %v63_v19  ;;  %v453_v46 = vpack.c.bf16 %v190_v44, %v189_v43  ;;  %v193_v50 = vld [vmem:[%s687_s5 + $0x20] sm:$0xff] }
   0x8   :  { %432 = vmatpush3.msk.msra.mxu0 %vm74_vm1, %v69_v8  ;;  %48 = vperm.xlu0 %474, %v579_v6   ;;  %v413_v56 = vld [vmem:[%s688_s6] ss:$0 sm:$0xff]  ;;  %s508_s6 = smov 60  }
   0x9   :  { %434 = vmatmul.mubr.msk.f32.vlgmr.msra.gmra.mrb[0].mxu0 %vm70_vm2, %v593_v9  ;;  %454 = vmatpush3.bf16.msra.mxu1 %v453_v46  ;;  %v416_v12 = vld [vmem:[%s690_s8] ss:$0 sm:$0xff] }
   0xa   :  { %455 = vmatprep.subr.bf16.mxu1 %v497_v0 }
   0xc   :  { %476 = vset.pattern.permute.xlu0 %v501_v7 }
   0xd   :  { %457 = vmatpush3.bf16.msra.mxu1 %v456_v48 }
   0xe   :  { %444 = vmatprep.subr.mxu1 %v499_v3  ;;  %v302_v3 = vld [vmem:[%s689_s7] sm:$0x3]  ;;  %s509_s7 = smov 126  }
   0xf   :  { %v331_v4 = vrot.slane %v302_v3, %v53_v15  ;;  %v307_v11 = vrot.slane %v302_v3, %v44_v14 }
  0x11   :  { %445 = vmatpush3.msra.mxu1 %v193_v50 }
  0x82   :  { %v40_v13 = vpop.permute.xlu0 %39 }
  0x83   :  { %v46_v21 = vmul.f32 %v45_v17, %v40_v13  ;;  %v59_v24 = vpop.permute.xlu1 %58 }
  0x84   :  { %v65_v26 = vmul.f32 %v64_v23, %v59_v24 }
  0x87   :  { %v49_v20 = vpop.permute.xlu0 %48 }
  0x88   :  { %v55_v22 = vmul.f32 %v54_v18, %v49_v20 }
  0x8a   :  { %v56_v25 = vadd.f32 %v55_v22, %v46_v21 }
  0x8c   :  { %v66_v27 = vadd.f32 %v65_v26, %v56_v25 }
  0xdc   :  { %v144_v28 = vpop.f32.mrb[0].mxu0 }
  0xdd   :  { %v148_v30 = vadd.f32 %v144_v28, %v66_v27  ;;  %v435_v31 = vpop.f32.mrb[1].mxu0 }
  0xdf   :  { %v156_v32 = vadd.f32 %v411_v29, %v148_v30 }
  0xe1   :  { %477 = vtanh.f32 %v156_v32  ;;  %v412_v34 = vmul.f32 -1.442695, %v156_v32 }
  0xe3   :  { %479 = vpow2.f32 %v412_v34 }
  0xeb   :  { %v478_v33 = vpop.eup %477 }
  0xec   :  { %166 = vrot.lane.b32.xlu1 %v478_v33, %s503_s2 }
  0xed   :  { %v480_v35 = vpop.eup %479 }
  0xee   :  { %v160_v36 = vadd.f32 1.0, %v480_v35 }
  0xf0   :  { %481 = vrcp.f32 %v160_v36 }
  0xfa   :  { %v482_v37 = vpop.eup %481 }
  0xfb   :  { %v164_v40 = vmul.f32 %v482_v37, %v593_v9 }
 0x15e   :  { %v167_v38 = vpop.permute.xlu1 %166 }
 0x15f   :  { %v169_v39 = vmul.f32 %v482_v37, %v167_v38 }
 0x161   :  { %171 = vrot.lane.b32.xlu1 %v169_v39, %s504_s24 }
 0x1d3   :  { %v172_v41 = vpop.permute.xlu1 %171 }
 0x1d4   :  { %v616_v42 = vadd.f32 %v172_v41, %v164_v40 }
 0x1d6   :  { %483 = vtanh.f32 %v616_v42 }
 0x1e0   :  { %v484_v49 = vpop.eup %483 }
 0x1e1   :  { %177 = vrot.lane.b32.xlu0 %v484_v49, %s505_s12 }
 0x1e5   :  { %185 = vrot.lane.b32.xlu0 %v593_v9, %s506_s13 }
 0x1e9   :  { %282 = vrot.lane.b32.xlu0 %v593_v9, %s503_s2 }
 0x253   :  { %v178_v51 = vpop.permute.xlu0 %177 }
 0x254   :  { %v180_v52 = vmul.f32 %v482_v37, %v178_v51 }
 0x256   :  { %182 = vrot.lane.b32.xlu1 %v180_v52, %s507_s16 }
 0x257   :  { %v186_v53 = vpop.permute.xlu0 %185 }
 0x25b   :  { %v283_v5 = vpop.permute.xlu0 %282 }
 0x2c8   :  { %v642_v54 = vpop.permute.xlu1 %182 }
 0x2c9   :  { %v188_v55 = vsel %vm70_vm2, %v642_v54, %v186_v53  ;;  %v395_v33 = vsel %vm70_vm2, %v642_v54, %v616_v42 }
 0x2ca   :  { %447 = vmatmul.mubr.msk.f32.vlgmr.msra.gmra.mrb[0].mxu1 %vm201_vm3, %v188_v55 }
 0x39d   :  { %v271_v57 = vpop.f32.mrb[0].mxu1 }
 0x39e   :  { %v272_v58 = vadd.f32 %v413_v56, %v271_v57  ;;  %v448_v59 = vpop.f32.mrb[1].mxu1 }
 0x3a0   :  { %485 = vtanh.f32 %v272_v58  ;;  %v415_v61 = vmul.f32 -1.442695, %v272_v58 }
 0x3a2   :  { %487 = vpow2.f32 %v415_v61 }
 0x3aa   :  { %v486_v60 = vpop.eup %485 }
 0x3ab   :  { %287 = vrot.lane.b32.xlu1 %v486_v60, %s503_s2 }
 0x3ac   :  { %v488_v62 = vpop.eup %487 }
 0x3ad   :  { %v278_v63 = vadd.f32 1.0, %v488_v62 }
 0x3af   :  { %489 = vrcp.f32 %v278_v63 }
 0x3b9   :  { %v490_v0 = vpop.eup %489 }
 0x3ba   :  { %v285_v7 = vmul.f32 %v490_v0, %v283_v5 }
 0x41d   :  { %v288_v1 = vpop.permute.xlu1 %287 }
 0x41e   :  { %v290_v2 = vmul.f32 %v490_v0, %v288_v1 }
 0x420   :  { %292 = vrot.lane.b32.xlu1 %v290_v2, %s504_s24 }
 0x424   :  { %333 = vrot.lane.b32.xlu1 %v331_v4, %s508_s6 }
 0x492   :  { %v293_v8 = vpop.permute.xlu1 %292 }
 0x493   :  { %v295_v9 = vadd.f32 %v293_v8, %v285_v7 }
 0x495   :  { %491 = vtanh.f32 %v295_v9 }
 0x496   :  { %v334_v16 = vpop.permute.xlu1 %333 }
 0x49f   :  { %v492_v10 = vpop.eup %491 }
 0x4a0   :  { %298 = vrot.lane.b32.xlu0 %v492_v10, %s505_s12 }
 0x4a4   :  { %309 = vrot.lane.b32.xlu0 %v307_v11, %s508_s6 }
 0x512   :  { %v299_v13 = vpop.permute.xlu0 %298 }
 0x513   :  { %v301_v17 = vmul.f32 %v490_v0, %v299_v13 }
 0x515   :  { %v336_v18 = vmul.f32 %v334_v16, %v301_v17 }
 0x516   :  { %v310_v19 = vpop.permute.xlu0 %309 }
 0x517   :  { %v312_v15 = vmul.f32 %v310_v19, %v301_v17  ;;  %338 = vrot.lane.b32.xlu1 %v336_v18, %s507_s16 }
 0x519   :  { %314 = vrot.lane.b32.xlu0 %v312_v15, %s507_s16 }
 0x589   :  { %v339_v20 = vpop.permute.xlu1 %338 }
 0x58a   :  { %v341_v21 = vsel %vm70_vm2, %v339_v20, 0.0 }
 0x58b   :  { %342 = vadd.xlane.f32.xlu1 %v341_v21  ;;  %v315_v22 = vpop.permute.xlu0 %314 }
 0x58c   :  { %v317_v23 = vsel %vm70_vm2, %v315_v22, 0.0 }
 0x58d   :  { %318 = vadd.xlane.f32.xlu0 %v317_v23 }
 0x5a3   :  { %364 = vrot.lane.b32.xlu0 %v579_v6, %s509_s7 }
 0x5a7   :  { %388 = vrot.lane.b32.xlu0 %v301_v17, %s506_s13 }
 0x5ab   :  { %392 = vrot.lane.b32.xlu0 %v295_v9, %s505_s12 }
 0x618   :  { %v343_v14 = vpop.xlane.xlu1 %342 }
 0x619   :  { %v344_v24 = vadd.f32 %v416_v12, %v343_v14 }
 0x61a   :  { %v319_v25 = vpop.xlane.xlu0 %318 }
 0x61b   :  { %v345_v26 = vmul.f32 0.1, %v344_v24  ;;  %v326_v27 = vadd.f32 %v416_v12, %v319_v25 }
 0x61d   :  { %v349_v28 = vand.u32 2147483647, %v345_v26  ;;  %v327_v29 = vmul.f32 0.1, %v326_v27  ;;  %v346_v46 = vmax.f32 %v345_v26, 0.0  ;;  %vm347_vm7 = vcmp.ne.f32.partialorder %v345_v26, %v345_v26 }
 0x61e   :  { %v365_v30 = vpop.permute.xlu0 %364 }
 0x61f   :  { %v350_v31 = vsub.f32 0.0, %v349_v28  ;;  %374 = vrot.lane.b32.xlu1 %v327_v29, %s510_s21 }
 0x621   :  { %v351_v6 = vmul.f32 1.442695, %v350_v31 }
 0x622   :  { %v389_v32 = vpop.permute.xlu0 %388 }
 0x623   :  { %493 = vpow2.f32 %v351_v6  ;;  %v396_v34 = vsel %vm201_vm3, %v395_v33, %v389_v32 }
 0x626   :  { %v393_v35 = vpop.permute.xlu0 %392 }
 0x627   :  { %v398_v36 = vsel %vm397_vm4, %v396_v34, %v393_v35 }
 0x628   :  { %400 = vst.msk [vmem:[%s691_s10] sm:$0xff] %vm399_vm5, %v398_v36 }
 0x62d   :  { %v494_v37 = vpop.eup %493 }
 0x62e   :  { %v353_v38 = vadd.f32 1.0, %v494_v37  ;;  %v356_v39 = vmul.f32 -0.5, %v494_v37  ;;  %v359_v41 = vand.u32 2147483647, %v494_v37 }
 0x630   :  { %495 = vlog2.f32 %v353_v38  ;;  %v357_v40 = vadd.f32 1.0, %v356_v39  ;;  %vm360_vm6 = vcmp.lt.f32.partialorder %v359_v41, 0.0004427343 }
 0x632   :  { %v358_v45 = vmul.f32 %v494_v37, %v357_v40 }
 0x63a   :  { %v496_v43 = vpop.eup %495 }
 0x63b   :  { %v355_v44 = vmul.f32 0.6931472, %v496_v43 }
 0x63d   :  { %v361_v42 = vsel %vm360_vm6, %v358_v45, %v355_v44 }
 0x63e   :  { %v362_v47 = vadd.f32 %v361_v42, %v346_v46 }
 0x640   :  { %v363_v48 = vsel %vm347_vm7, %v345_v26, %v362_v47 }
 0x641   :  { %v367_v49 = vmul.f32 %v365_v30, %v363_v48 }
 0x643   :  { %369 = vrot.lane.b32.xlu1 %v367_v49, %s511_s3 }
 0x647   :  { %378 = vrot.lane.b32.xlu1 %v363_v48, %s510_s21 }
 0x691   :  { %v375_v50 = vpop.permute.xlu1 %374 }
 0x6b5   :  { %v370_v51 = vpop.permute.xlu1 %369 }
 0x6b6   :  { %v372_v52 = vadd.f32 %v370_v51, %v327_v29 }
 0x6b8   :  { %v382_v53 = vsel %vm381_vm8, %v372_v52, %v375_v50 }
 0x6b9   :  { %v379_v54 = vpop.permute.xlu1 %378 }
 0x6ba   :  { %v384_v55 = vsel %vm383_vm9, %v382_v53, %v379_v54 }
 0x6bb   :  { %386 = vst.msk [vmem:[%s692_s9] sm:$0xff] %vm385_vm10, %v384_v55 }

</bundles_post_ra>
